<compile_context>
chip_gen: v6e
topology: v6e:2x2x1
jax: 0.10.0
libtpu: 0.0.40
codegen_flags: <defaults>
</compile_context>

<pallas_src>
import functools

import jax
import jax.numpy as jnp
from jax.experimental import pallas as pl
from jax.experimental.pallas import tpu as pltpu

HIDDEN = 128
GRIDLESS_MAX_B = 1024             # above this, use the batch-tiled grid (2 TCs on v7x)
GRIDLESS_VMEM_BUDGET = 12 << 20   # whole-array-resident cap (fits v5e's 16 MiB scoped default)
TILE_VMEM_BUDGET = 24 << 20       # budget for double-buffered x/out tiles on the gridded path
VMEM_LIMIT_BYTES = 48 << 20       # keep headroom under v7x's 64 MiB physical VMEM
MAX_BATCH_TILE = 8192
MIN_BATCH_TILE = 256


def _round_up(x, m):
    return ((x + m - 1) // m) * m


def actor_kernel(x_ref, w1_ref, b1_ref, w2_ref, b2_ref, out_ref):
    """fc1 -> ReLU -> fc2 -> tanh, fused.

    Both matmuls accumulate in f32 on the MXU; all elementwise work (bias add,
    ReLU, tanh) is done in f32 regardless of the MXU operand dtype.
    """
    h = jnp.dot(x_ref[...], w1_ref[...], preferred_element_type=jnp.float32)
    h = jnp.maximum(h + b1_ref[...], 0.0)
    h = h.astype(w2_ref.dtype)  # feed the second matmul in the weight dtype (bf16 or f32)
    y = jnp.dot(h, w2_ref[...], preferred_element_type=jnp.float32) + b2_ref[...]
    out_ref[...] = jnp.tanh(y).astype(out_ref.dtype)


@functools.partial(jax.jit, static_argnames=("use_bf16", "out_dtype"))
def actor_forward(state, w1, b1, w2, b2, *, use_bf16=None, out_dtype=jnp.float32):
    B, D_in = state.shape
    H, D_out = w2.shape

    # Accept 1-D (PyTorch-style) or 2-D biases; kernel broadcast-adds (1, N).
    b1 = b1.reshape(1, -1).astype(jnp.float32)
    b2 = b2.reshape(1, -1).astype(jnp.float32)

    out_bytes = jnp.dtype(out_dtype).itemsize

    # ---- Path selection (all shapes are Python ints at trace time) ----------
    weights_bytes = (D_in * HIDDEN + HIDDEN + HIDDEN * D_out + D_out) * 4
    gridless_footprint = B * (D_in * 4 + D_out * out_bytes) + weights_bytes
    gridless = (B <= GRIDLESS_MAX_B) and (gridless_footprint <= GRIDLESS_VMEM_BUDGET)

    if use_bf16 is None:
        # Default: bf16 MXU operands on the bandwidth-bound gridded path,
        # exact f32 on the small gridless path.
        use_bf16 = not gridless
    in_bytes = 2 if use_bf16 else 4

    if use_bf16:
        state = state.astype(jnp.bfloat16)
        w1 = w1.astype(jnp.bfloat16)
        w2 = w2.astype(jnp.bfloat16)
    else:
        state = state.astype(jnp.float32)
        w1 = w1.astype(jnp.float32)
        w2 = w2.astype(jnp.float32)

    if gridless:
        # Small batch: no grid -> no pipeline machinery, no per-step overhead.
        # Every operand is whole-array VMEM resident.
        vmem = pl.BlockSpec(memory_space=pltpu.MemorySpace.VMEM)
        return pl.pallas_call(
            actor_kernel,
            out_shape=jax.ShapeDtypeStruct((B, D_out), out_dtype),
            in_specs=[vmem] * 5,
            out_specs=vmem,
            compiler_params=pltpu.CompilerParams(vmem_limit_bytes=VMEM_LIMIT_BYTES),
        )(state, w1, b1, w2, b2)

    # ---- Large batch: tile only the batch axis (ragged grid, no pads) -------
    row_bytes = D_in * in_bytes + D_out * out_bytes
    tb_cap = TILE_VMEM_BUDGET // (2 * row_bytes)          # double-buffered x + out tiles
    tb_cap = max(MIN_BATCH_TILE, min(MAX_BATCH_TILE, tb_cap))
    # >= 2 grid steps for mid-size batches so both v7x TensorCores get work.
    tb = min(tb_cap, _round_up(pl.cdiv(B, 2), 8))
    tb = max(8, (tb // 8) * 8)

    out = pl.pallas_call(
        actor_kernel,
        out_shape=jax.ShapeDtypeStruct((B, D_out), out_dtype),
        grid=(pl.cdiv(B, tb),),
        in_specs=[
            pl.BlockSpec((tb, D_in), lambda i: (i, 0)),       # x tile (ragged last block)
            pl.BlockSpec((D_in, HIDDEN), lambda i: (0, 0)),   # W1 resident across steps
            pl.BlockSpec((1, HIDDEN), lambda i: (0, 0)),      # b1 resident
            pl.BlockSpec((HIDDEN, D_out), lambda i: (0, 0)),  # W2 resident
            pl.BlockSpec((1, D_out), lambda i: (0, 0)),       # b2 resident
        ],
        out_specs=pl.BlockSpec((tb, D_out), lambda i: (i, 0)),
        compiler_params=pltpu.CompilerParams(
            dimension_semantics=("parallel",),
            vmem_limit_bytes=VMEM_LIMIT_BYTES,
        ),
    )(state, w1, b1, w2, b2)
    return out


def init_actor_params(key, input_dim, output_dim):
    """Deterministic init matching PyTorch nn.Linear default U(-1/sqrt(fan_in), 1/sqrt(fan_in))."""
    k1, k2, k3, k4 = jax.random.split(key, 4)
    bound1 = 1.0 / jnp.sqrt(jnp.float32(input_dim))
    bound2 = 1.0 / jnp.sqrt(jnp.float32(HIDDEN))
    w1 = jax.random.uniform(k1, (input_dim, HIDDEN), jnp.float32, -bound1, bound1)
    b1 = jax.random.uniform(k2, (HIDDEN,), jnp.float32, -bound1, bound1)
    w2 = jax.random.uniform(k3, (HIDDEN, output_dim), jnp.float32, -bound2, bound2)
    b2 = jax.random.uniform(k4, (output_dim,), jnp.float32, -bound2, bound2)
    return w1, b1, w2, b2


def actor_reference(state, w1, b1, w2, b2):
    """Pure-JAX reference for correctness check."""
    h = jnp.maximum(state @ w1 + b1.reshape(1, -1), 0.0)
    return jnp.tanh(h @ w2 + b2.reshape(1, -1))


if __name__ == "__main__":
    key = jax.random.PRNGKey(0)
    k_params, k_state = jax.random.split(key)

    batch, input_dim, output_dim = 4, 32, 8
    w1, b1, w2, b2 = init_actor_params(k_params, input_dim, output_dim)
    state = jax.random.normal(k_state, (batch, input_dim), jnp.float32)
    ref = actor_reference(state, w1, b1, w2, b2)

    # Gridless small-batch path, default dtype policy (f32) — tight tolerance.
    out = actor_forward(state, w1, b1, w2, b2)
    jax.block_until_ready(out)
    assert out.shape == (batch, output_dim)
    assert jnp.allclose(out, ref, atol=1e-5, rtol=1e-5)

    # Explicit bf16 MXU operands (bandwidth win on v6e/v7x) — looser tolerance.
    out_bf16 = actor_forward(state, w1, b1, w2, b2, use_bf16=True)
    jax.block_until_ready(out_bf16)
    assert jnp.allclose(out_bf16, ref, atol=2e-2, rtol=2e-2)

    # Gridded ('parallel') path: batch above the gridless threshold and NOT a
    # multiple of the tile (exercises the ragged last block). Default policy
    # picks bf16 MXU operands here -> looser tolerance.
    big_batch = GRIDLESS_MAX_B + 37
    state_big = jax.random.normal(k_state, (big_batch, input_dim), jnp.float32)
    ref_big = actor_reference(state_big, w1, b1, w2, b2)
    out_big = actor_forward(state_big, w1, b1, w2, b2)
    jax.block_until_ready(out_big)
    assert out_big.shape == (big_batch, output_dim)
    assert jnp.allclose(out_big, ref_big, atol=2e-2, rtol=2e-2)

    # Gridded path with f32 operands — tight tolerance vs. reference.
    out_big_f32 = actor_forward(state_big, w1, b1, w2, b2, use_bf16=False)
    jax.block_until_ready(out_big_f32)
    assert jnp.allclose(out_big_f32, ref_big, atol=1e-5, rtol=1e-5)

    print("KERNEL_OK")
</pallas_src>

<mosaic_0001>
module attributes {stable_mosaic.version = 11 : i64} {
  func.func @actor_kernel(%arg0: memref<4x32xf32, #tpu.memory_space<vmem>>, %arg1: memref<32x128xf32, #tpu.memory_space<vmem>>, %arg2: memref<1x128xf32, #tpu.memory_space<vmem>>, %arg3: memref<128x8xf32, #tpu.memory_space<vmem>>, %arg4: memref<1x8xf32, #tpu.memory_space<vmem>>, %arg5: memref<4x8xf32, #tpu.memory_space<vmem>>) attributes {dimension_semantics = [], scalar_prefetch = 0 : i64, scratch_operands = 0 : i64, tpu.core_type = #tpu.core_type<tc>} {
    %c0 = arith.constant 0 : index
    %c0_0 = arith.constant 0 : index
    %0 = vector.load %arg0[%c0, %c0_0] : memref<4x32xf32, #tpu.memory_space<vmem>>, vector<4x32xf32>
    %c0_1 = arith.constant 0 : index
    %c0_2 = arith.constant 0 : index
    %1 = vector.load %arg1[%c0_1, %c0_2] : memref<32x128xf32, #tpu.memory_space<vmem>>, vector<32x128xf32>
    %cst = arith.constant dense<0.000000e+00> : vector<4x128xf32>
    %2 = tpu.matmul %0, %1, %cst {dimension_numbers = #tpu.dot_dimension_numbers<[1], [0], [0], [1], [0, 0, 1, 1], [], []>} : vector<4x32xf32>, vector<32x128xf32>, vector<4x128xf32> -> vector<4x128xf32>
    %c0_3 = arith.constant 0 : index
    %c0_4 = arith.constant 0 : index
    %3 = vector.load %arg2[%c0_3, %c0_4] : memref<1x128xf32, #tpu.memory_space<vmem>>, vector<1x128xf32>
    %4 = vector.broadcast %3 : vector<1x128xf32> to vector<4x128xf32>
    %5 = arith.addf %2, %4 : vector<4x128xf32>
    %cst_5 = arith.constant 0.000000e+00 : f32
    %6 = vector.broadcast %cst_5 : f32 to vector<4x128xf32>
    %7 = arith.maximumf %5, %6 : vector<4x128xf32>
    %c0_6 = arith.constant 0 : index
    %c0_7 = arith.constant 0 : index
    %8 = vector.load %arg3[%c0_6, %c0_7] : memref<128x8xf32, #tpu.memory_space<vmem>>, vector<128x8xf32>
    %cst_8 = arith.constant dense<0.000000e+00> : vector<4x8xf32>
    %9 = tpu.matmul %7, %8, %cst_8 {dimension_numbers = #tpu.dot_dimension_numbers<[1], [0], [0], [1], [0, 0, 1, 1], [], []>} : vector<4x128xf32>, vector<128x8xf32>, vector<4x8xf32> -> vector<4x8xf32>
    %c0_9 = arith.constant 0 : index
    %c0_10 = arith.constant 0 : index
    %10 = vector.load %arg4[%c0_9, %c0_10] : memref<1x8xf32, #tpu.memory_space<vmem>>, vector<1x8xf32>
    %11 = vector.broadcast %10 : vector<1x8xf32> to vector<4x8xf32>
    %12 = arith.addf %9, %11 : vector<4x8xf32>
    %13 = math.tanh %12 : vector<4x8xf32>
    %c0_11 = arith.constant 0 : index
    %c0_12 = arith.constant 0 : index
    %14 = vector.load %arg5[%c0_11, %c0_12] : memref<4x8xf32, #tpu.memory_space<vmem>>, vector<4x8xf32>
    tpu.vector_store %arg5[%c0_11, %c0_12], %13 {strides = array<i32>} : memref<4x8xf32, #tpu.memory_space<vmem>>, vector<4x8xf32>,
    return
  }
}

</mosaic_0001>

<bundles_post_ra>
// kernel: actor_forward.1
= control target key start
LH: loop header
LB: loop body
LE: loop exit
PB: predicated region body
PF: predicated region fallthrough
CT: control target
= control target key end

     0   :  { %v316_v1 = vmov 0.0   ;;  %vm317_vm0 = vmmov 0   ;;  %vm33_vm1 = vcmask 261120   ;;  %s445_s0 = inlined_call_operand.vmem [shape: f32[4,32], index: 0, kind: input, shape index: {}]   ;;  %s446_s1 = inlined_call_operand.vmem [shape: f32[32,128], index: 1, kind: input, shape index: {}]   ;;  %s447_s2 = inlined_call_operand.vmem [shape: f32[1,128], index: 2, kind: input, shape index: {}]   ;;  %s448_s3 = inlined_call_operand.vmem [shape: f32[128,8], index: 3, kind: input, shape index: {}]   ;;  %s449_s4 = inlined_call_operand.vmem [shape: f32[1,8], index: 4, kind: input, shape index: {}]   ;;  %s450_s5 = inlined_call_operand.hbm [shape: f32[4,8], index: 5, kind: output, shape index: {}]  }
   0x1   :  { %v25_v0 = vld [vmem:[%s446_s1 + $0x18] sm:$0xff]  ;;  %243 = vmatprep.subr.mxu0 %v316_v1  ;;  %v24_v2 = vld [vmem:[%s446_s1 + $0x10] sm:$0xff]  ;;  %251 = vmatprep.mubr.msk.f32.mxu0 %vm317_vm0, %v316_v1  ;;  %v23_v5 = vld [vmem:[%s446_s1 + $0x8] sm:$0xff] }
   0x2   :  { %v123_v3 = vld [vmem:[%s448_s3 + $0x78] sm:$0xff]  ;;  %244 = vmatpush3.msra.mxu0 %v25_v0  ;;  %254 = vmatprep.subr.mxu1 %v316_v1  ;;  %v122_v4 = vld [vmem:[%s448_s3 + $0x70] sm:$0xff]  ;;  %v121_v6 = vld [vmem:[%s448_s3 + $0x68] sm:$0xff] }
   0x3   :  { %245 = vmatprep.subr.mxu0 %v316_v1  ;;  %255 = vmatpush3.msra.mxu1 %v123_v3  ;;  %v22_v7 = vld [vmem:[%s446_s1] sm:$0xff] }
   0x4   :  { %246 = vmatpush3.msra.mxu0 %v24_v2  ;;  %256 = vmatprep.subr.mxu1 %v316_v1  ;;  %v21_v8 = vld [vmem:[%s445_s0] sm:$0xf] }
   0x5   :  { %247 = vmatprep.subr.mxu0 %v316_v1  ;;  %257 = vmatpush3.msra.mxu1 %v122_v4  ;;  %v120_v9 = vld [vmem:[%s448_s3 + $0x60] sm:$0xff] }
   0x6   :  { %248 = vmatpush3.msra.mxu0 %v23_v5  ;;  %258 = vmatprep.subr.mxu1 %v316_v1 }
   0x7   :  { %10 = vsyncpa [#allocation3], 0  ;;  %249 = vmatprep.subr.mxu0 %v316_v1  ;;  %259 = vmatpush3.msra.mxu1 %v121_v6  ;;  %v119_v10 = vld [vmem:[%s448_s3 + $0x58] sm:$0xff]  ;;  %v118_v11 = vld [vmem:[%s448_s3 + $0x50] sm:$0xff]  ;;  %s318_s11 = smov [#allocation2]   ;;  %vm202_vm2 = vcmask 60416  }
   0x8   :  { %250 = vmatpush3.msra.mxu0 %v22_v7  ;;  %260 = vmatprep.subr.mxu1 %v316_v1  ;;  %v117_v12 = vld [vmem:[%s448_s3 + $0x48] sm:$0xff]  ;;  %v116_v13 = vld [vmem:[%s448_s3 + $0x40] sm:$0xff]  ;;  %v115_v14 = vld [vmem:[%s448_s3 + $0x38] sm:$0xff] }
   0x9   :  { %252 = vmatmul.mubr.msk.f32.vlgmr.msra.gmra.mxu0 %vm33_vm1, %v21_v8  ;;  %261 = vmatpush3.msra.mxu1 %v120_v9  ;;  %v114_v15 = vld [vmem:[%s448_s3 + $0x30] sm:$0xff]  ;;  %v113_v16 = vld [vmem:[%s448_s3 + $0x28] sm:$0xff]  ;;  %v112_v17 = vld [vmem:[%s448_s3 + $0x20] sm:$0xff] }
   0xa   :  { %262 = vmatprep.subr.mxu1 %v316_v1  ;;  %286 = vmatprep.mubr.msk.f32.mxu1 %vm317_vm0, %v316_v1  ;;  %v111_v18 = vld [vmem:[%s448_s3 + $0x18] sm:$0xff]  ;;  %v110_v19 = vld [vmem:[%s448_s3 + $0x10] sm:$0xff]  ;;  %v109_v20 = vld [vmem:[%s448_s3 + $0x8] sm:$0xff] }
   0xb   :  { %263 = vmatpush3.msra.mxu1 %v119_v10  ;;  %v108_v21 = vld [vmem:[%s448_s3] sm:$0xff]  ;;  %s210_s3 = sshll.u32 %s318_s11, 4  ;;  %s211_s3 = int_to_ptr.vmem [resolvable:$true] %s210_s3 }
   0xc   :  { %264 = vmatprep.subr.mxu1 %v316_v1  ;;  %v218_v22 = vld [vmem:[%s447_s2] ss:$0 sm:$0xff]  ;;  %s294_s2 = scalar_lea.vmem %s211_s3, 64  ;;  %p299_p1 = scmp.lt.s32.totalorder %s211_s3, %s211_s3 }
   0xd   :  { %265 = vmatpush3.msra.mxu1 %v118_v11  ;;  %v220_v27 = vld [vmem:[%s449_s4] ss:$0 sm:$0xff]  ;;  %p295_p0 = scmp.ne.s32.totalorder %s211_s3, %s294_s2  ;;  %p300_p2 = scmp.lt.s32.totalorder %s294_s2, %s294_s2 }
   0xe   :  { %266 = vmatprep.subr.mxu1 %v316_v1 }
   0xf   :  { %267 = vmatpush3.msra.mxu1 %v117_v12  ;;  %p301_p3 = por %p300_p2, %p299_p1 }
  0x10   :  { %268 = vmatprep.subr.mxu1 %v316_v1 }
  0x11   :  { %269 = vmatpush3.msra.mxu1 %v116_v13  ;;  %p302_p4 = pnand %p301_p3, %p295_p0 }
  0x12   :  { %270 = vmatprep.subr.mxu1 %v316_v1 }
  0x13   :  { %271 = vmatpush3.msra.mxu1 %v115_v14 }
  0x14   :  { %272 = vmatprep.subr.mxu1 %v316_v1 }
  0x15   :  { %273 = vmatpush3.msra.mxu1 %v114_v15 }
  0x16   :  { %274 = vmatprep.subr.mxu1 %v316_v1 }
  0x17   :  { %275 = vmatpush3.msra.mxu1 %v113_v16 }
  0x18   :  { %276 = vmatprep.subr.mxu1 %v316_v1 }
  0x19   :  { %277 = vmatpush3.msra.mxu1 %v112_v17 }
  0x1a   :  { %278 = vmatprep.subr.mxu1 %v316_v1 }
  0x1b   :  { %279 = vmatpush3.msra.mxu1 %v111_v18 }
  0x1c   :  { %280 = vmatprep.subr.mxu1 %v316_v1 }
  0x1d   :  { %281 = vmatpush3.msra.mxu1 %v110_v19 }
  0x1e   :  { %282 = vmatprep.subr.mxu1 %v316_v1 }
  0x1f   :  { %283 = vmatpush3.msra.mxu1 %v109_v20 }
  0x20   :  { %284 = vmatprep.subr.mxu1 %v316_v1 }
  0x21   :  { %285 = vmatpush3.msra.mxu1 %v108_v21 }
  0xc9   :  { %v103_v23 = vpop.f32.mrf.mxu0 }
  0xca   :  { %v104_v24 = vadd.f32 %v218_v22, %v103_v23 }
  0xcb   :  { %v253_v25 = vpop.f32.mrf.mxu0 }
  0xcc   :  { %v107_v26 = vmax.f32 %v104_v24, 0.0 }
  0xce   :  { %287 = vmatmul.mubr.f32.vlgmr.msra.gmra.mxu1 %v107_v26 }
 0x18e   :  { %v197_v28 = vpop.f32.mrf.mxu1 }
 0x18f   :  { %v198_v29 = vadd.f32 %v220_v27, %v197_v28 }
 0x190   :  { %v288_v30 = vpop.f32.mrf.mxu1 }
 0x191   :  { %292 = vtanh.f32 %v198_v29 }
 0x19e   :  { %v293_v31 = vpop.eup %292 }
 0x19f   :  { %203 = vst.msk [vmem:[#allocation2] sm:$0xf] %vm202_vm2, %v293_v31 }
 0x1a0   :  { %305 = shalt.err (!%p302_p4)
}
 0x1a1   :  { %213 = dma.vmem_to_hbm [thread:$0]  %s211_s3, 64, %s450_s5, [#allocation3]  }
 0x1a2   :  { %314 = dma.done.wait [#allocation3], 64  }
 0x1a3   :  { %315 = vsyncadd [#allocation3], 4294967232 }
 0x1a4   :  { %217 = vsyncpa [#allocation3], 1 }

</bundles_post_ra>
